<compile_context>
chip_gen: v6e
topology: v6e:2x2x1
jax: 0.10.0
libtpu: 0.0.40
codegen_flags: <defaults>
</compile_context>

<pallas_src>
import functools

import jax
import jax.numpy as jnp
import numpy as np
from jax.experimental import pallas as pl
from jax.experimental.pallas import tpu as pltpu

RELU_SHIFT = 1e-10


# ----------------------------------------------------------------------------
# Kernel 1: CDNA linear layer + relu-shift + normalization (fused)
#   y = relu(x @ W + b - eps) + eps ;  y /= sum(y)  (sum over all 243 features)
# ----------------------------------------------------------------------------
def cdna_params_kernel(x_ref, w_ref, b_ref, out_ref):
    y = jnp.dot(x_ref[...], w_ref[...], preferred_element_type=jnp.float32)
    y = y + b_ref[...]
    y = jnp.maximum(y - RELU_SHIFT, 0.0) + RELU_SHIFT
    out_ref[...] = y / jnp.sum(y, axis=1, keepdims=True)


def cdna_params(cdna_input, w, b):
    B, F = cdna_input.shape
    O = w.shape[1]
    return pl.pallas_call(
        cdna_params_kernel,
        out_shape=jax.ShapeDtypeStruct((B, O), jnp.float32),
        grid=(1,),
        in_specs=[
            pl.BlockSpec((B, F), lambda i: (0, 0)),
            pl.BlockSpec((F, O), lambda i: (0, 0)),
            pl.BlockSpec((1, O), lambda i: (0, 0)),
        ],
        out_specs=pl.BlockSpec((B, O), lambda i: (0, 0)),
    )(cdna_input, w, b)


# ----------------------------------------------------------------------------
# Kernel 2 (fused, grid=(B, n_tiles)):
#   tile 0 of each image: zero-halo flat copy + 27-row column-shifted staging
#   every tile: 9 accumulating MXU matmuls (vertical tap = static lane offset),
#               mask softmax (single reciprocal) + masked blend, lane-dense out.
# ----------------------------------------------------------------------------
def fused_transform_blend_kernel(kern_ref, logits_ref, framef_ref, framet_ref,
                                 out_ref, buf, xsh,
                                 *, W, K, C, pad, n_terms, T, n_tiles,
                                 HWp, off_al, delta, Lbuf, slab, KC, KC_pad,
                                 B_pad):
    tile = pl.program_id(1)

    # ---- per-image one-time setup ------------------------------------------
    @pl.when(tile == 0)
    def _build():
        # flat zero-halo copy of the image, frame at a 128-aligned lane offset
        if off_al > 0:
            buf[:, 0:off_al] = jnp.zeros((C, off_al), jnp.float32)
        buf[:, off_al:off_al + HWp] = framef_ref[0]
        if Lbuf - off_al - HWp > 0:
            buf[:, off_al + HWp:Lbuf] = jnp.zeros(
                (C, Lbuf - off_al - HWp), jnp.float32)

        # per-tile slabs of the 27 (kx, c)-major column-shifted images, padded
        # to 32 rows.  Every lane of every row is written (incl. the pad rows),
        # so no stale VMEM can reach the MXU.
        for t in range(n_tiles):
            base = t * T
            # output-column index of each lane, generated in-kernel (no HBM mask)
            xcol = (base + jax.lax.broadcasted_iota(jnp.int32, (1, slab), 1)) % W
            for kx in range(K):
                valid = (xcol >= (pad - kx)) & (xcol < (W + pad - kx))
                win = buf[:, base + kx + delta:base + kx + delta + slab]
                xsh[t, kx * C:(kx + 1) * C, :] = win * valid.astype(jnp.float32)
            if KC_pad > KC:
                xsh[t, KC:KC_pad, :] = jnp.zeros((KC_pad - KC, slab),
                                                 jnp.float32)

    # ---- all B transformed images for this tile: 9 accumulating matmuls -----
    slab_ref = xsh.at[tile]                       # (KC_pad, slab) view
    acc = jnp.zeros((B_pad, T), jnp.float32)
    for ky in range(K):
        rhs = slab_ref[:, ky * W:ky * W + T]      # static lane slice, (KC_pad, T)
        acc = acc + jnp.dot(kern_ref[ky], rhs,
                            preferred_element_type=jnp.float32)

    # ---- softmax over mask channels (one reciprocal) + masked blend ----------
    logits = logits_ref[0]                                        # (M, T)
    e = jnp.exp(logits - jnp.max(logits, axis=0, keepdims=True))
    inv = 1.0 / jnp.sum(e, axis=0, keepdims=True)                 # (1, T)
    out = e[0:1, :] * framet_ref[0]                               # (C, T)
    for j in range(n_terms):
        out = out + acc[j:j + 1, :] * e[j + 1:j + 2, :]
    out_ref[0] = out * inv


# ----------------------------------------------------------------------------
# Wrapper reproducing the Generate forward's CDNA branch
# ----------------------------------------------------------------------------
def generate_cdna_forward(last_frame, cdna_input, mask_logits, w_cdna, b_cdna,
                          K=9, tile_lanes=2048):
    B, C, H, W = last_frame.shape
    M = mask_logits.shape[1]
    pad = (K - 1) // 2
    HW = H * W
    KC = K * C
    KC_pad = ((KC + 7) // 8) * 8          # 27 -> 32 (sublane multiple)
    B_pad = ((B + 7) // 8) * 8            # pad LHS rows to a full sublane group
    n_terms = min(B, M - 1)               # zip(next_transformed, mask_list[1:])

    # ---- kernel 1: normalized CDNA kernels (torch (B, C, K, K) layout) ------
    y = cdna_params(cdna_input, w_cdna, b_cdna)          # (B, C*K*K)
    cdna_kerns = y.reshape(B, C, K, K)

    # conv-as-matmul LHS: kern_lhs[ky, b, kx*C + c] = cdna_kerns[b, c, ky, kx];
    # zero-padded rows/cols stay exact zeros (0 * 0 stays finite).
    lhs = jnp.transpose(cdna_kerns, (2, 0, 3, 1)).reshape(K, B, KC)
    kern_lhs = jnp.pad(lhs, ((0, 0), (0, B_pad - B), (0, KC_pad - KC)))

    # ---- tiling of the flattened spatial axis --------------------------------
    if HW <= tile_lanes:
        T, n_tiles = HW, 1
    else:
        T = max(128, (tile_lanes // 128) * 128)
        n_tiles = -(-HW // T)
    HWp = n_tiles * T                      # no partial blocks anywhere

    frame_flat = jnp.pad(last_frame.reshape(B, C, HW),
                         ((0, 0), (0, 0), (0, HWp - HW)))
    logits_flat = jnp.pad(mask_logits.reshape(B, M, HW),
                          ((0, 0), (0, 0), (0, HWp - HW)))

    # staging-buffer geometry (all python ints)
    off0 = pad * W + pad                   # frame offset in the conceptual halo
    off_al = ((off0 + 127) // 128) * 128   # 128-aligned placement -> clean copy
    delta = off_al - off0
    slab = ((T + 2 * pad * W + 127) // 128) * 128
    Lbuf = (n_tiles - 1) * T + slab + 2 * pad + delta

    kernel = functools.partial(
        fused_transform_blend_kernel,
        W=W, K=K, C=C, pad=pad, n_terms=n_terms, T=T, n_tiles=n_tiles,
        HWp=HWp, off_al=off_al, delta=delta, Lbuf=Lbuf, slab=slab,
        KC=KC, KC_pad=KC_pad, B_pad=B_pad)

    out_flat = pl.pallas_call(
        kernel,
        out_shape=jax.ShapeDtypeStruct((B, C, HWp), jnp.float32),
        grid=(B, n_tiles),
        in_specs=[
            pl.BlockSpec((K, B_pad, KC_pad), lambda b, t: (0, 0, 0)),  # kernels
            pl.BlockSpec((1, M, T), lambda b, t: (b, 0, t)),           # logits tile
            pl.BlockSpec((1, C, HWp), lambda b, t: (b, 0, 0)),         # full frame
            pl.BlockSpec((1, C, T), lambda b, t: (b, 0, t)),           # frame tile
        ],
        out_specs=pl.BlockSpec((1, C, T), lambda b, t: (b, 0, t)),
        scratch_shapes=[
            pltpu.VMEM((C, Lbuf), jnp.float32),            # flat zero-halo image
            pltpu.VMEM((n_tiles, KC_pad, slab), jnp.float32),  # shifted staging
        ],
        compiler_params=pltpu.CompilerParams(
            dimension_semantics=("parallel", "arbitrary"),
            vmem_limit_bytes=32 * 1024 * 1024),
    )(kern_lhs, logits_flat, frame_flat, frame_flat)

    return out_flat[:, :, :HW].reshape(B, C, H, W), cdna_kerns


# ----------------------------------------------------------------------------
# Pure-JAX reference for verification
# ----------------------------------------------------------------------------
def reference_forward(last_frame, cdna_input, mask_logits, w, b):
    B = cdna_input.shape[0]
    y = cdna_input @ w + b
    y = jnp.maximum(y - RELU_SHIFT, 0.0) + RELU_SHIFT
    kerns = y.reshape(B, -1, 9, 9)
    kerns = kerns / jnp.sum(kerns, axis=(1, 2, 3), keepdims=True)
    kerns = kerns.reshape(B, 3, 9, 9)
    transformed = jax.lax.conv_general_dilated(
        last_frame, kerns, window_strides=(1, 1), padding=[(4, 4), (4, 4)],
        dimension_numbers=("NCHW", "OIHW", "NCHW"))
    masks = jax.nn.softmax(mask_logits, axis=1)
    out = masks[:, 0:1] * last_frame
    n_terms = min(B, masks.shape[1] - 1)
    for i in range(n_terms):
        out = out + transformed[:, i:i + 1] * masks[:, i + 1:i + 2]
    return out, kerns


if __name__ == "__main__":
    key = jax.random.PRNGKey(0)
    B = 2            # batch_size
    Z = 8            # z_dim (small stand-in for 128)
    H = W = 16       # spatial (small stand-in for 112)
    C = 3            # color channels
    K = 9            # CDNA kernel size
    NUM_MASKS = 8    # -> 9 mask channels

    F_in = 7 * 7 * 4 * Z          # CDNA linear in_features = 7*7*4*z_dim
    F_out = K * K * C             # CDNA linear out_features

    k1, k2, k3, k4, k5 = jax.random.split(key, 5)
    last_frame = jax.random.uniform(k1, (B, C, H, W), jnp.float32)
    # stand-ins for flatten(hidden_state5) and the decoder's mask logits (see TODO)
    cdna_input = jax.random.normal(k2, (B, F_in), jnp.float32) * 0.1
    mask_logits = jax.random.normal(k3, (B, NUM_MASKS + 1, H, W), jnp.float32)

    # deterministic parameter init for cdna.cdna_params (nn.Linear)
    w_cdna = jax.random.normal(k4, (F_in, F_out), jnp.float32) * 0.02
    b_cdna = jax.random.normal(k5, (1, F_out), jnp.float32) * 0.01

    # small tile_lanes so the multi-tile (HW-tiled) path is exercised at this size
    out, kerns = generate_cdna_forward(last_frame, cdna_input, mask_logits,
                                       w_cdna, b_cdna, K=K, tile_lanes=128)
    out = jax.block_until_ready(out)

    ref_out, ref_kerns = reference_forward(last_frame, cdna_input, mask_logits,
                                           w_cdna, b_cdna[0])
    np.testing.assert_allclose(np.asarray(out), np.asarray(ref_out),
                               rtol=2e-4, atol=1e-5)
    np.testing.assert_allclose(np.asarray(kerns), np.asarray(ref_kerns),
                               rtol=2e-4, atol=1e-6)
    assert out.shape == (B, C, H, W)
    print("KERNEL_OK")
</pallas_src>

<mosaic_0001>
module attributes {stable_mosaic.version = 11 : i64} {
  func.func @cdna_params_kernel(%arg0: i32, %arg1: memref<2x1568xf32, #tpu.memory_space<vmem>>, %arg2: memref<1568x243xf32, #tpu.memory_space<vmem>>, %arg3: memref<1x243xf32, #tpu.memory_space<vmem>>, %arg4: memref<2x243xf32, #tpu.memory_space<vmem>>) attributes {dimension_semantics = [#tpu.dimension_semantics<arbitrary>], iteration_bounds = array<i64: 1>, scalar_prefetch = 0 : i64, scratch_operands = 0 : i64, tpu.core_type = #tpu.core_type<tc>, window_params = [{pipeline_mode = #tpu.pipeline_mode<synchronous>, transform_indices = @transform_0, window_bounds = array<i64: 2, 1568>}, {pipeline_mode = #tpu.pipeline_mode<synchronous>, transform_indices = @transform_1, window_bounds = array<i64: 1568, 243>}, {pipeline_mode = #tpu.pipeline_mode<synchronous>, transform_indices = @transform_2, window_bounds = array<i64: 1, 243>}, {pipeline_mode = #tpu.pipeline_mode<synchronous>, transform_indices = @transform_3, window_bounds = array<i64: 2, 243>}]} {
    %c0 = arith.constant 0 : index
    %c0_0 = arith.constant 0 : index
    %0 = vector.load %arg1[%c0, %c0_0] : memref<2x1568xf32, #tpu.memory_space<vmem>>, vector<2x1568xf32>
    %c0_1 = arith.constant 0 : index
    %c0_2 = arith.constant 0 : index
    %1 = vector.load %arg2[%c0_1, %c0_2] : memref<1568x243xf32, #tpu.memory_space<vmem>>, vector<1568x243xf32>
    %cst = arith.constant dense<0.000000e+00> : vector<2x243xf32>
    %2 = tpu.matmul %0, %1, %cst {dimension_numbers = #tpu.dot_dimension_numbers<[1], [0], [0], [1], [0, 0, 1, 1], [], []>} : vector<2x1568xf32>, vector<1568x243xf32>, vector<2x243xf32> -> vector<2x243xf32>
    %c0_3 = arith.constant 0 : index
    %c0_4 = arith.constant 0 : index
    %3 = vector.load %arg3[%c0_3, %c0_4] : memref<1x243xf32, #tpu.memory_space<vmem>>, vector<1x243xf32>
    %4 = vector.broadcast %3 : vector<1x243xf32> to vector<2x243xf32>
    %5 = arith.addf %2, %4 : vector<2x243xf32>
    %cst_5 = arith.constant 1.000000e-10 : f32
    %6 = vector.broadcast %cst_5 : f32 to vector<2x243xf32>
    %7 = arith.subf %5, %6 : vector<2x243xf32>
    %cst_6 = arith.constant 0.000000e+00 : f32
    %8 = vector.broadcast %cst_6 : f32 to vector<2x243xf32>
    %9 = arith.maximumf %7, %8 : vector<2x243xf32>
    %cst_7 = arith.constant 1.000000e-10 : f32
    %10 = vector.broadcast %cst_7 : f32 to vector<2x243xf32>
    %11 = arith.addf %9, %10 : vector<2x243xf32>
    %cst_8 = arith.constant dense<0.000000e+00> : vector<2xf32>
    %12 = vector.multi_reduction <add>, %11, %cst_8 [1] : vector<2x243xf32> to vector<2xf32>
    %13 = vector.shape_cast %12 : vector<2xf32> to vector<2x1xf32>
    %14 = vector.broadcast %13 : vector<2x1xf32> to vector<2x243xf32>
    %15 = arith.divf %11, %14 : vector<2x243xf32>
    %c0_9 = arith.constant 0 : index
    %c0_10 = arith.constant 0 : index
    %16 = vector.load %arg4[%c0_9, %c0_10] : memref<2x243xf32, #tpu.memory_space<vmem>>, vector<2x243xf32>
    tpu.vector_store %arg4[%c0_9, %c0_10], %15 {strides = array<i32>} : memref<2x243xf32, #tpu.memory_space<vmem>>, vector<2x243xf32>,
    return
  }
  func.func @transform_0(%arg0: i32) -> (i32, i32) {
    %c0_i32 = arith.constant 0 : i32
    %c0_i32_0 = arith.constant 0 : i32
    %c0_i32_1 = arith.constant 0 : i32
    return %c0_i32, %c0_i32_0 : i32, i32
  }
  func.func @transform_1(%arg0: i32) -> (i32, i32) {
    %c0_i32 = arith.constant 0 : i32
    %c0_i32_0 = arith.constant 0 : i32
    %c0_i32_1 = arith.constant 0 : i32
    return %c0_i32, %c0_i32_0 : i32, i32
  }
  func.func @transform_2(%arg0: i32) -> (i32, i32) {
    %c0_i32 = arith.constant 0 : i32
    %c0_i32_0 = arith.constant 0 : i32
    %c0_i32_1 = arith.constant 0 : i32
    return %c0_i32, %c0_i32_0 : i32, i32
  }
  func.func @transform_3(%arg0: i32) -> (i32, i32) {
    %c0_i32 = arith.constant 0 : i32
    %c0_i32_0 = arith.constant 0 : i32
    %c0_i32_1 = arith.constant 0 : i32
    return %c0_i32, %c0_i32_0 : i32, i32
  }
}

</mosaic_0001>

<bundles_post_ra>
// kernel: tpu_custom_call.1
= control target key start
LH: loop header
LB: loop body
LE: loop exit
PB: predicated region body
PF: predicated region fallthrough
CT: control target
= control target key end

     0   :  { %8 = vsyncpa [#allocation3], 0  ;;  %s1239_s0 = inlined_call_operand.hbm [shape: f32[2,1568], index: 0, kind: input, shape index: {}]   ;;  %s1240_s1 = inlined_call_operand.hbm [shape: f32[1568,243], index: 1, kind: input, shape index: {}]   ;;  %s1241_s2 = inlined_call_operand.hbm [shape: f32[1,243], index: 2, kind: input, shape index: {}]   ;;  %s1242_s3 = inlined_call_operand.hbm [shape: f32[2,243], index: 3, kind: output, shape index: {}]  }
   0x1   :  { %9 = vsyncpa [#allocation6], 0 }
   0x2   :  { %10 = vsyncpa [#allocation4], 0  ;;  %s1183_s12 = smov [#allocation5]  }
   0x3   :  { %s26_s13 = sshll.u32 %s1183_s12, 4  ;;  %s27_s13 = int_to_ptr.vmem [resolvable:$true] %s26_s13 }
   0x4   :  { %s1105_s14 = scalar_lea.vmem %s27_s13, 50176  ;;  %p1110_p1 = scmp.lt.s32.totalorder %s27_s13, %s27_s13 }
   0x5   :  { %p1106_p0 = scmp.ne.s32.totalorder %s27_s13, %s1105_s14  ;;  %p1111_p2 = scmp.lt.s32.totalorder %s1105_s14, %s1105_s14 }
   0x7   :  { %p1112_p3 = por %p1111_p2, %p1110_p1 }
   0x9   :  { %p1113_p4 = pnand %p1112_p3, %p1106_p0 }
   0xb   :  { %1116 = shalt.err (!%p1113_p4)
}
   0xc   :  { %s1184_s15 = smov 256   ;;  %s1185_s16 = smov 16  }
   0xd   :  { %32 = dma.hbm_to_vmem [thread:$0]  %s1240_s1, 50176, %s27_s13, [#allocation6], %s1184_s15, %s1184_s15, %s1185_s16  }
   0xe   :  { %s1186_s19 = smov [#allocation2]   ;;  %s1187_s21 = smov [#allocation7]  }
   0xf   :  { %s17_s20 = sshll.u32 %s1186_s19, 4  ;;  %s39_s22 = sshll.u32 %s1187_s21, 4  ;;  %s18_s20 = int_to_ptr.vmem [resolvable:$true] %s17_s20  ;;  %s40_s22 = int_to_ptr.vmem [resolvable:$true] %s39_s22 }
  0x10   :  { %s1125_s23 = scalar_lea.vmem %s18_s20, 416  ;;  %p1130_p6 = scmp.lt.s32.totalorder %s18_s20, %s18_s20 }
  0x11   :  { %p1126_p5 = scmp.ne.s32.totalorder %s18_s20, %s1125_s23  ;;  %p1131_p7 = scmp.lt.s32.totalorder %s1125_s23, %s1125_s23 }
  0x13   :  { %p1132_p8 = por %p1131_p7, %p1130_p6 }
  0x15   :  { %p1133_p9 = pnand %p1132_p8, %p1126_p5 }
  0x17   :  { %1136 = shalt.err (!%p1133_p9)
}
  0x18   :  { %20 = dma.hbm_to_vmem [thread:$0]  %s1239_s0, 416, %s18_s20, [#allocation3]  }
  0x19   :  { %s1145_s26 = scalar_lea.vmem %s40_s22, 32  ;;  %p1150_p11 = scmp.lt.s32.totalorder %s40_s22, %s40_s22 }
  0x1a   :  { %p1146_p10 = scmp.ne.s32.totalorder %s40_s22, %s1145_s26  ;;  %p1151_p12 = scmp.lt.s32.totalorder %s1145_s26, %s1145_s26 }
  0x1c   :  { %p1152_p13 = por %p1151_p12, %p1150_p11 }
  0x1e   :  { %p1153_p0 = pnand %p1152_p13, %p1146_p10 }
  0x20   :  { %1156 = shalt.err (!%p1153_p0)
}
  0x21   :  { %42 = dma.hbm_to_vmem [thread:$0]  %s1241_s2, 32, %s40_s22, [#allocation6]  }
  0x22   :  { %1177 = dma.done.wait [#allocation3], 416  }
  0x23   :  { %1178 = vsyncadd [#allocation3], 4294966880 }
  0x24   :  { %1179 = dma.done.wait [#allocation6], 50208  }
  0x25   :  { %1180 = vsyncadd [#allocation6], 4294917088  ;;  %v87_v0 = vld [vmem:[#allocation5 + $0xf8] sm:$0xff]  ;;  %v86_v1 = vld [vmem:[#allocation5 + $0xf0] sm:$0xff]  ;;  %vm534_vm0 = vcmask 261120   ;;  %vm1040_vm1 = vcmask 1041408  }
  0x26   :  { %v85_v2 = vld [vmem:[#allocation5 + $0xe8] sm:$0xff]  ;;  %537 = vmatprep.subr.mxu0 %v87_v0  ;;  %v151_v3 = vld [vmem:[#allocation5 + $0x2f8] sm:$0xff]  ;;  %v84_v4 = vld [vmem:[#allocation5 + $0xe0] sm:$0xff]  ;;  %vm1042_vm2 = vcmask 934912   ;;  %vm1061_vm3 = vcmask 936962   ;;  %s1190_s0 = smov [#allocation8]  }
  0x27   :  { %v150_v5 = vld [vmem:[#allocation5 + $0x2f0] sm:$0xff]  ;;  %538 = vmatpush1.msra.mxu0 %v86_v1  ;;  %608 = vmatprep.subr.mxu1 %v151_v3  ;;  %v83_v6 = vld [vmem:[#allocation5 + $0xd8] sm:$0xff]  ;;  %v149_v7 = vld [vmem:[#allocation5 + $0x2e8] sm:$0xff]  ;;  %s1070_s2 = sshll.u32 %s1190_s0, 4  ;;  %s1071_s2 = int_to_ptr.vmem [resolvable:$true] %s1070_s2 }
  0x28   :  { %539 = vmatprep.subr.mxu0 %v85_v2  ;;  %609 = vmatpush1.msra.mxu1 %v150_v5  ;;  %v82_v8 = vld [vmem:[#allocation5 + $0xd0] sm:$0xff]  ;;  %v148_v9 = vld [vmem:[#allocation5 + $0x2e0] sm:$0xff]  ;;  %v147_v10 = vld [vmem:[#allocation5 + $0x2d8] sm:$0xff]  ;;  %s1157_s28 = scalar_lea.vmem %s1071_s2, 64  ;;  %p1162_p2 = scmp.lt.s32.totalorder %s1071_s2, %s1071_s2 }
  0x29   :  { %540 = vmatpush1.msra.mxu0 %v84_v4  ;;  %610 = vmatprep.subr.mxu1 %v149_v7  ;;  %v81_v11 = vld [vmem:[#allocation5 + $0xc8] sm:$0xff]  ;;  %v146_v12 = vld [vmem:[#allocation5 + $0x2d0] sm:$0xff]  ;;  %v80_v13 = vld [vmem:[#allocation5 + $0xc0] sm:$0xff]  ;;  %p1158_p1 = scmp.ne.s32.totalorder %s1071_s2, %s1157_s28  ;;  %p1163_p3 = scmp.lt.s32.totalorder %s1157_s28, %s1157_s28 }
  0x2a   :  { %541 = vmatprep.subr.mxu0 %v83_v6  ;;  %611 = vmatpush1.msra.mxu1 %v148_v9  ;;  %v145_v14 = vld [vmem:[#allocation5 + $0x2c8] sm:$0xff]  ;;  %v79_v15 = vld [vmem:[#allocation5 + $0xb8] sm:$0xff]  ;;  %v144_v16 = vld [vmem:[#allocation5 + $0x2c0] sm:$0xff] }
  0x2b   :  { %542 = vmatpush1.msra.mxu0 %v82_v8  ;;  %612 = vmatprep.subr.mxu1 %v147_v10  ;;  %v78_v17 = vld [vmem:[#allocation5 + $0xb0] sm:$0xff]  ;;  %v143_v18 = vld [vmem:[#allocation5 + $0x2b8] sm:$0xff]  ;;  %v77_v19 = vld [vmem:[#allocation5 + $0xa8] sm:$0xff]  ;;  %p1164_p4 = por %p1163_p3, %p1162_p2 }
  0x2c   :  { %543 = vmatprep.subr.mxu0 %v81_v11  ;;  %613 = vmatpush1.msra.mxu1 %v146_v12  ;;  %v142_v20 = vld [vmem:[#allocation5 + $0x2b0] sm:$0xff]  ;;  %v76_v21 = vld [vmem:[#allocation5 + $0xa0] sm:$0xff]  ;;  %v141_v22 = vld [vmem:[#allocation5 + $0x2a8] sm:$0xff] }
  0x2d   :  { %544 = vmatpush1.msra.mxu0 %v80_v13  ;;  %614 = vmatprep.subr.mxu1 %v145_v14  ;;  %v75_v23 = vld [vmem:[#allocation5 + $0x98] sm:$0xff]  ;;  %v140_v24 = vld [vmem:[#allocation5 + $0x2a0] sm:$0xff]  ;;  %v74_v25 = vld [vmem:[#allocation5 + $0x90] sm:$0xff]  ;;  %p1165_p5 = pnand %p1164_p4, %p1158_p1 }
  0x2e   :  { %545 = vmatprep.subr.mxu0 %v79_v15  ;;  %615 = vmatpush1.msra.mxu1 %v144_v16  ;;  %v139_v26 = vld [vmem:[#allocation5 + $0x298] sm:$0xff]  ;;  %v73_v27 = vld [vmem:[#allocation5 + $0x88] sm:$0xff]  ;;  %v138_v28 = vld [vmem:[#allocation5 + $0x290] sm:$0xff] }
  0x2f   :  { %546 = vmatpush1.msra.mxu0 %v78_v17  ;;  %616 = vmatprep.subr.mxu1 %v143_v18  ;;  %v72_v29 = vld [vmem:[#allocation5 + $0x80] sm:$0xff]  ;;  %v137_v30 = vld [vmem:[#allocation5 + $0x288] sm:$0xff]  ;;  %v71_v31 = vld [vmem:[#allocation5 + $0x78] sm:$0xff] }
  0x30   :  { %547 = vmatprep.subr.mxu0 %v77_v19  ;;  %617 = vmatpush1.msra.mxu1 %v142_v20  ;;  %v136_v32 = vld [vmem:[#allocation5 + $0x280] sm:$0xff]  ;;  %v70_v33 = vld [vmem:[#allocation5 + $0x70] sm:$0xff]  ;;  %v135_v34 = vld [vmem:[#allocation5 + $0x278] sm:$0xff] }
  0x31   :  { %548 = vmatpush1.msra.mxu0 %v76_v21  ;;  %618 = vmatprep.subr.mxu1 %v141_v22  ;;  %v69_v35 = vld [vmem:[#allocation5 + $0x68] sm:$0xff]  ;;  %v134_v36 = vld [vmem:[#allocation5 + $0x270] sm:$0xff]  ;;  %v68_v37 = vld [vmem:[#allocation5 + $0x60] sm:$0xff] }
  0x32   :  { %549 = vmatprep.subr.mxu0 %v75_v23  ;;  %619 = vmatpush1.msra.mxu1 %v140_v24  ;;  %v133_v38 = vld [vmem:[#allocation5 + $0x268] sm:$0xff]  ;;  %v67_v39 = vld [vmem:[#allocation5 + $0x58] sm:$0xff]  ;;  %v132_v40 = vld [vmem:[#allocation5 + $0x260] sm:$0xff] }
  0x33   :  { %550 = vmatpush1.msra.mxu0 %v74_v25  ;;  %620 = vmatprep.subr.mxu1 %v139_v26  ;;  %v66_v41 = vld [vmem:[#allocation5 + $0x50] sm:$0xff]  ;;  %v131_v42 = vld [vmem:[#allocation5 + $0x258] sm:$0xff]  ;;  %v65_v43 = vld [vmem:[#allocation5 + $0x48] sm:$0xff] }
  0x34   :  { %551 = vmatprep.subr.mxu0 %v73_v27  ;;  %621 = vmatpush1.msra.mxu1 %v138_v28  ;;  %v130_v44 = vld [vmem:[#allocation5 + $0x250] sm:$0xff]  ;;  %v64_v45 = vld [vmem:[#allocation5 + $0x40] sm:$0xff]  ;;  %v129_v46 = vld [vmem:[#allocation5 + $0x248] sm:$0xff]  ;;  %v450_v27 = vlaneseq  ;;  %v1188_v28 = vmov 1983009808  }
  0x35   :  { %552 = vmatpush1.msra.mxu0 %v72_v29  ;;  %622 = vmatprep.subr.mxu1 %v137_v30  ;;  %v63_v47 = vld [vmem:[#allocation5 + $0x38] sm:$0xff]  ;;  %v128_v48 = vld [vmem:[#allocation5 + $0x240] sm:$0xff]  ;;  %v62_v49 = vld [vmem:[#allocation5 + $0x30] sm:$0xff]  ;;  %v466_v29 = vunpack.c.l.s4 %v1188_v28 }
  0x36   :  { %553 = vmatprep.subr.mxu0 %v71_v31  ;;  %623 = vmatpush1.msra.mxu1 %v136_v32  ;;  %v127_v50 = vld [vmem:[#allocation5 + $0x238] sm:$0xff]  ;;  %v61_v51 = vld [vmem:[#allocation5 + $0x28] sm:$0xff]  ;;  %v126_v52 = vld [vmem:[#allocation5 + $0x230] sm:$0xff] }
  0x37   :  { %554 = vmatpush1.msra.mxu0 %v70_v33  ;;  %624 = vmatprep.subr.mxu1 %v135_v34  ;;  %v60_v53 = vld [vmem:[#allocation5 + $0x20] sm:$0xff]  ;;  %v125_v54 = vld [vmem:[#allocation5 + $0x228] sm:$0xff]  ;;  %v59_v55 = vld [vmem:[#allocation5 + $0x18] sm:$0xff] }
  0x38   :  { %555 = vmatprep.subr.mxu0 %v69_v35  ;;  %625 = vmatpush1.msra.mxu1 %v134_v36  ;;  %v124_v56 = vld [vmem:[#allocation5 + $0x220] sm:$0xff]  ;;  %v58_v57 = vld [vmem:[#allocation5 + $0x10] sm:$0xff]  ;;  %v123_v58 = vld [vmem:[#allocation5 + $0x218] sm:$0xff] }
  0x39   :  { %556 = vmatpush1.msra.mxu0 %v68_v37  ;;  %626 = vmatprep.subr.mxu1 %v133_v38  ;;  %v57_v59 = vld [vmem:[#allocation5 + $0x8] sm:$0xff]  ;;  %v122_v60 = vld [vmem:[#allocation5 + $0x210] sm:$0xff]  ;;  %v56_v61 = vld [vmem:[#allocation5] sm:$0xff]  ;;  %v1220_v38 = vshrl.u32 %v450_v27, 7 }
  0x3a   :  { %557 = vmatprep.subr.mxu0 %v67_v39  ;;  %627 = vmatpush1.msra.mxu1 %v132_v40  ;;  %v121_v62 = vld [vmem:[#allocation5 + $0x208] sm:$0xff]  ;;  %v119_v63 = vld [vmem:[#allocation5 + $0x1f8] sm:$0xff]  ;;  %v120_v0 = vld [vmem:[#allocation5 + $0x200] sm:$0xff]  ;;  %v467_v39 = vunpack.c.0.s8 %v466_v29 }
  0x3b   :  { %558 = vmatpush1.msra.mxu0 %v66_v41  ;;  %628 = vmatprep.subr.mxu1 %v131_v42  ;;  %v118_v1 = vld [vmem:[#allocation5 + $0x1f0] sm:$0xff]  ;;  %v183_v2 = vld [vmem:[#allocation5 + $0x3f8] sm:$0xff]  ;;  %v117_v3 = vld [vmem:[#allocation5 + $0x1e8] sm:$0xff] }
  0x3c   :  { %559 = vmatprep.subr.mxu0 %v65_v43  ;;  %629 = vmatpush1.msra.mxu1 %v130_v44  ;;  %v182_v4 = vld [vmem:[#allocation5 + $0x3f0] sm:$0xff]  ;;  %v116_v5 = vld [vmem:[#allocation5 + $0x1e0] sm:$0xff]  ;;  %v181_v6 = vld [vmem:[#allocation5 + $0x3e8] sm:$0xff] }
  0x3d   :  { %560 = vmatpush1.msra.mxu0 %v64_v45  ;;  %630 = vmatprep.subr.mxu1 %v129_v46  ;;  %v115_v7 = vld [vmem:[#allocation5 + $0x1d8] sm:$0xff]  ;;  %v180_v8 = vld [vmem:[#allocation5 + $0x3e0] sm:$0xff]  ;;  %v114_v9 = vld [vmem:[#allocation5 + $0x1d0] sm:$0xff] }
  0x3e   :  { %561 = vmatprep.subr.mxu0 %v63_v47  ;;  %631 = vmatpush1.msra.mxu1 %v128_v48  ;;  %v179_v10 = vld [vmem:[#allocation5 + $0x3d8] sm:$0xff]  ;;  %v113_v11 = vld [vmem:[#allocation5 + $0x1c8] sm:$0xff]  ;;  %v178_v12 = vld [vmem:[#allocation5 + $0x3d0] sm:$0xff]  ;;  %v1223_v48 = vsub.s32 %v467_v39, %v1220_v38 }
  0x3f   :  { %562 = vmatpush1.msra.mxu0 %v62_v49  ;;  %632 = vmatprep.subr.mxu1 %v127_v50  ;;  %v112_v13 = vld [vmem:[#allocation5 + $0x1c0] sm:$0xff]  ;;  %v177_v14 = vld [vmem:[#allocation5 + $0x3c8] sm:$0xff]  ;;  %v111_v15 = vld [vmem:[#allocation5 + $0x1b8] sm:$0xff] }
  0x40   :  { %563 = vmatprep.subr.mxu0 %v61_v51  ;;  %633 = vmatpush1.msra.mxu1 %v126_v52  ;;  %v176_v16 = vld [vmem:[#allocation5 + $0x3c0] sm:$0xff]  ;;  %v110_v17 = vld [vmem:[#allocation5 + $0x1b0] sm:$0xff]  ;;  %v175_v18 = vld [vmem:[#allocation5 + $0x3b8] sm:$0xff] }
  0x41   :  { %564 = vmatpush1.msra.mxu0 %v60_v53  ;;  %634 = vmatprep.subr.mxu1 %v125_v54  ;;  %v109_v19 = vld [vmem:[#allocation5 + $0x1a8] sm:$0xff]  ;;  %v174_v20 = vld [vmem:[#allocation5 + $0x3b0] sm:$0xff]  ;;  %v108_v21 = vld [vmem:[#allocation5 + $0x1a0] sm:$0xff] }
  0x42   :  { %565 = vmatprep.subr.mxu0 %v59_v55  ;;  %635 = vmatpush1.msra.mxu1 %v124_v56  ;;  %v173_v22 = vld [vmem:[#allocation5 + $0x3a8] sm:$0xff]  ;;  %v107_v23 = vld [vmem:[#allocation5 + $0x198] sm:$0xff]  ;;  %v172_v24 = vld [vmem:[#allocation5 + $0x3a0] sm:$0xff] }
  0x43   :  { %566 = vmatpush1.msra.mxu0 %v58_v57  ;;  %636 = vmatprep.subr.mxu1 %v123_v58  ;;  %v106_v25 = vld [vmem:[#allocation5 + $0x190] sm:$0xff]  ;;  %v171_v26 = vld [vmem:[#allocation5 + $0x398] sm:$0xff]  ;;  %v105_v30 = vld [vmem:[#allocation5 + $0x188] sm:$0xff] }
  0x44   :  { %567 = vmatprep.subr.mxu0 %v57_v59  ;;  %637 = vmatpush1.msra.mxu1 %v122_v60  ;;  %v170_v31 = vld [vmem:[#allocation5 + $0x390] sm:$0xff]  ;;  %v104_v32 = vld [vmem:[#allocation5 + $0x180] sm:$0xff]  ;;  %v169_v33 = vld [vmem:[#allocation5 + $0x388] sm:$0xff] }
  0x45   :  { %568 = vmatpush1.msra.mxu0 %v56_v61  ;;  %638 = vmatprep.subr.mxu1 %v121_v62  ;;  %v103_v34 = vld [vmem:[#allocation5 + $0x178] sm:$0xff]  ;;  %v168_v35 = vld [vmem:[#allocation5 + $0x380] sm:$0xff]  ;;  %v102_v36 = vld [vmem:[#allocation5 + $0x170] sm:$0xff] }
  0x46   :  { %569 = vmatprep.subr.mxu0 %v119_v63  ;;  %639 = vmatpush1.msra.mxu1 %v120_v0  ;;  %v167_v37 = vld [vmem:[#allocation5 + $0x378] sm:$0xff]  ;;  %v101_v40 = vld [vmem:[#allocation5 + $0x168] sm:$0xff]  ;;  %v166_v41 = vld [vmem:[#allocation5 + $0x370] sm:$0xff] }
  0x47   :  { %570 = vmatpush2.msra.mxu0 %v118_v1  ;;  %640 = vmatprep.subr.mxu1 %v183_v2  ;;  %v100_v42 = vld [vmem:[#allocation5 + $0x160] sm:$0xff]  ;;  %v165_v43 = vld [vmem:[#allocation5 + $0x368] sm:$0xff]  ;;  %v99_v44 = vld [vmem:[#allocation5 + $0x158] sm:$0xff] }
  0x48   :  { %571 = vmatprep.subr.mxu0 %v117_v3  ;;  %641 = vmatpush2.msra.mxu1 %v182_v4  ;;  %v164_v45 = vld [vmem:[#allocation5 + $0x360] sm:$0xff]  ;;  %v98_v46 = vld [vmem:[#allocation5 + $0x150] sm:$0xff]  ;;  %v163_v47 = vld [vmem:[#allocation5 + $0x358] sm:$0xff] }
  0x49   :  { %572 = vmatpush2.msra.mxu0 %v116_v5  ;;  %642 = vmatprep.subr.mxu1 %v181_v6  ;;  %v97_v49 = vld [vmem:[#allocation5 + $0x148] sm:$0xff]  ;;  %v162_v50 = vld [vmem:[#allocation5 + $0x350] sm:$0xff]  ;;  %v96_v52 = vld [vmem:[#allocation5 + $0x140] sm:$0xff] }
  0x4a   :  { %573 = vmatprep.subr.mxu0 %v115_v7  ;;  %643 = vmatpush2.msra.mxu1 %v180_v8  ;;  %v52_v51 = vld [vmem:[#allocation2] sm:$0xff]  ;;  %v95_v54 = vld [vmem:[#allocation5 + $0x138] sm:$0xff]  ;;  %v94_v56 = vld [vmem:[#allocation5 + $0x130] sm:$0xff] }
  0x4b   :  { %574 = vmatpush2.msra.mxu0 %v114_v9  ;;  %644 = vmatprep.subr.mxu1 %v179_v10  ;;  %v161_v53 = vld [vmem:[#allocation5 + $0x348] sm:$0xff]  ;;  %v160_v55 = vld [vmem:[#allocation5 + $0x340] sm:$0xff]  ;;  %v159_v57 = vld [vmem:[#allocation5 + $0x338] sm:$0xff]  ;;  %v471_v58 = vrot.slane %v52_v51, %v1223_v48  ;;  %v464_v59 = vcombine.high %v52_v51, %v52_v51 }
  0x4c   :  { %575 = vmatprep.subr.mxu0 %v113_v11  ;;  %645 = vmatpush2.msra.mxu1 %v178_v12  ;;  %v93_v60 = vld [vmem:[#allocation5 + $0x128] sm:$0xff]  ;;  %v158_v61 = vld [vmem:[#allocation5 + $0x330] sm:$0xff]  ;;  %v92_v62 = vld [vmem:[#allocation5 + $0x120] sm:$0xff] }
  0x4d   :  { %576 = vmatpush2.msra.mxu0 %v112_v13  ;;  %646 = vmatprep.subr.mxu1 %v177_v14  ;;  %v157_v63 = vld [vmem:[#allocation5 + $0x328] sm:$0xff]  ;;  %v91_v0 = vld [vmem:[#allocation5 + $0x118] sm:$0xff]  ;;  %v156_v1 = vld [vmem:[#allocation5 + $0x320] sm:$0xff]  ;;  %v479_v4 = vcombine.high %v471_v58, %v471_v58  ;;  %v478_v5 = vrot.slane %v464_v59, %v1223_v48 }
  0x4e   :  { %577 = vmatprep.subr.mxu0 %v111_v15  ;;  %647 = vmatpush2.msra.mxu1 %v176_v16  ;;  %v90_v2 = vld [vmem:[#allocation5 + $0x110] sm:$0xff]  ;;  %v155_v3 = vld [vmem:[#allocation5 + $0x318] sm:$0xff]  ;;  %v89_v6 = vld [vmem:[#allocation5 + $0x108] sm:$0xff] }
  0x4f   :  { %578 = vmatpush2.msra.mxu0 %v110_v17  ;;  %648 = vmatprep.subr.mxu1 %v175_v18  ;;  %v88_v7 = vld [vmem:[#allocation5 + $0x100] sm:$0xff]  ;;  %v154_v8 = vld [vmem:[#allocation5 + $0x310] sm:$0xff]  ;;  %v153_v9 = vld [vmem:[#allocation5 + $0x308] sm:$0xff]  ;;  %v480_v12 = vcombine.high %v478_v5, %v478_v5 }
  0x50   :  { %579 = vmatprep.subr.mxu0 %v109_v19  ;;  %649 = vmatpush2.msra.mxu1 %v174_v20  ;;  %v215_v10 = vld [vmem:[#allocation5 + $0x4f8] sm:$0xff]  ;;  %v152_v11 = vld [vmem:[#allocation5 + $0x300] sm:$0xff]  ;;  %v214_v13 = vld [vmem:[#allocation5 + $0x4f0] sm:$0xff] }
  0x51   :  { %580 = vmatpush2.msra.mxu0 %v108_v21  ;;  %650 = vmatprep.subr.mxu1 %v173_v22  ;;  %v213_v14 = vld [vmem:[#allocation5 + $0x4e8] sm:$0xff]  ;;  %v279_v15 = vld [vmem:[#allocation5 + $0x6f8] sm:$0xff]  ;;  %v212_v16 = vld [vmem:[#allocation5 + $0x4e0] sm:$0xff] }
  0x52   :  { %581 = vmatprep.subr.mxu0 %v107_v23  ;;  %651 = vmatpush2.msra.mxu1 %v172_v24  ;;  %v278_v17 = vld [vmem:[#allocation5 + $0x6f0] sm:$0xff]  ;;  %v211_v18 = vld [vmem:[#allocation5 + $0x4d8] sm:$0xff]  ;;  %v277_v19 = vld [vmem:[#allocation5 + $0x6e8] sm:$0xff] }
  0x53   :  { %582 = vmatpush2.msra.mxu0 %v106_v25  ;;  %652 = vmatprep.subr.mxu1 %v171_v26  ;;  %v210_v20 = vld [vmem:[#allocation5 + $0x4d0] sm:$0xff]  ;;  %v276_v21 = vld [vmem:[#allocation5 + $0x6e0] sm:$0xff]  ;;  %v209_v22 = vld [vmem:[#allocation5 + $0x4c8] sm:$0xff] }
  0x54   :  { %583 = vmatprep.subr.mxu0 %v105_v30  ;;  %653 = vmatpush2.msra.mxu1 %v170_v31  ;;  %v275_v23 = vld [vmem:[#allocation5 + $0x6d8] sm:$0xff]  ;;  %v208_v24 = vld [vmem:[#allocation5 + $0x4c0] sm:$0xff]  ;;  %v274_v25 = vld [vmem:[#allocation5 + $0x6d0] sm:$0xff] }
  0x55   :  { %584 = vmatpush2.msra.mxu0 %v104_v32  ;;  %654 = vmatprep.subr.mxu1 %v169_v33  ;;  %v207_v26 = vld [vmem:[#allocation5 + $0x4b8] sm:$0xff]  ;;  %v273_v27 = vld [vmem:[#allocation5 + $0x6c8] sm:$0xff]  ;;  %v206_v28 = vld [vmem:[#allocation5 + $0x4b0] sm:$0xff] }
  0x56   :  { %585 = vmatprep.subr.mxu0 %v103_v34  ;;  %655 = vmatpush2.msra.mxu1 %v168_v35  ;;  %v272_v29 = vld [vmem:[#allocation5 + $0x6c0] sm:$0xff]  ;;  %v205_v30 = vld [vmem:[#allocation5 + $0x4a8] sm:$0xff]  ;;  %v271_v31 = vld [vmem:[#allocation5 + $0x6b8] sm:$0xff] }
  0x57   :  { %586 = vmatpush2.msra.mxu0 %v102_v36  ;;  %656 = vmatprep.subr.mxu1 %v167_v37  ;;  %v204_v32 = vld [vmem:[#allocation5 + $0x4a0] sm:$0xff]  ;;  %v270_v33 = vld [vmem:[#allocation5 + $0x6b0] sm:$0xff]  ;;  %v203_v34 = vld [vmem:[#allocation5 + $0x498] sm:$0xff] }
  0x58   :  { %587 = vmatprep.subr.mxu0 %v101_v40  ;;  %657 = vmatpush2.msra.mxu1 %v166_v41  ;;  %v269_v35 = vld [vmem:[#allocation5 + $0x6a8] sm:$0xff]  ;;  %v202_v36 = vld [vmem:[#allocation5 + $0x490] sm:$0xff]  ;;  %v268_v37 = vld [vmem:[#allocation5 + $0x6a0] sm:$0xff] }
  0x59   :  { %588 = vmatpush2.msra.mxu0 %v100_v42  ;;  %658 = vmatprep.subr.mxu1 %v165_v43  ;;  %v201_v39 = vld [vmem:[#allocation5 + $0x488] sm:$0xff]  ;;  %v267_v40 = vld [vmem:[#allocation5 + $0x698] sm:$0xff]  ;;  %v200_v41 = vld [vmem:[#allocation5 + $0x480] sm:$0xff] }
  0x5a   :  { %589 = vmatprep.subr.mxu0 %v99_v44  ;;  %659 = vmatpush2.msra.mxu1 %v164_v45  ;;  %v266_v42 = vld [vmem:[#allocation5 + $0x690] sm:$0xff]  ;;  %v199_v43 = vld [vmem:[#allocation5 + $0x478] sm:$0xff]  ;;  %v265_v44 = vld [vmem:[#allocation5 + $0x688] sm:$0xff] }
  0x5b   :  { %590 = vmatpush2.msra.mxu0 %v98_v46  ;;  %660 = vmatprep.subr.mxu1 %v163_v47  ;;  %v198_v45 = vld [vmem:[#allocation5 + $0x470] sm:$0xff]  ;;  %v264_v46 = vld [vmem:[#allocation5 + $0x680] sm:$0xff]  ;;  %v197_v47 = vld [vmem:[#allocation5 + $0x468] sm:$0xff] }
  0x5c   :  { %591 = vmatprep.subr.mxu0 %v97_v49  ;;  %661 = vmatpush2.msra.mxu1 %v162_v50  ;;  %v263_v49 = vld [vmem:[#allocation5 + $0x678] sm:$0xff]  ;;  %v196_v50 = vld [vmem:[#allocation5 + $0x460] sm:$0xff]  ;;  %v262_v51 = vld [vmem:[#allocation5 + $0x670] sm:$0xff] }
  0x5d   :  { %592 = vmatpush2.msra.mxu0 %v96_v52  ;;  %662 = vmatprep.subr.mxu1 %v161_v53  ;;  %v195_v52 = vld [vmem:[#allocation5 + $0x458] sm:$0xff]  ;;  %v261_v53 = vld [vmem:[#allocation5 + $0x668] sm:$0xff]  ;;  %v258_v59 = vld [vmem:[#allocation5 + $0x650] sm:$0xff] }
  0x5e   :  { %593 = vmatprep.subr.mxu0 %v95_v54  ;;  %663 = vmatpush2.msra.mxu1 %v160_v55  ;;  %v194_v54 = vld [vmem:[#allocation5 + $0x450] sm:$0xff]  ;;  %v260_v55 = vld [vmem:[#allocation5 + $0x660] sm:$0xff]  ;;  %vm1062_vm4 = vmor %vm1061_vm3, %vm1040_vm1 }
  0x5f   :  { %594 = vmatpush2.msra.mxu0 %v94_v56  ;;  %664 = vmatprep.subr.mxu1 %v159_v57  ;;  %v193_v56 = vld [vmem:[#allocation5 + $0x448] sm:$0xff]  ;;  %v259_v57 = vld [vmem:[#allocation5 + $0x658] sm:$0xff] }
  0x60   :  { %595 = vmatprep.subr.mxu0 %v93_v60  ;;  %665 = vmatpush2.msra.mxu1 %v158_v61  ;;  %v191_v60 = vld [vmem:[#allocation5 + $0x438] sm:$0xff]  ;;  %v257_v61 = vld [vmem:[#allocation5 + $0x648] sm:$0xff] }
  0x61   :  { %596 = vmatpush2.msra.mxu0 %v92_v62  ;;  %666 = vmatprep.subr.mxu1 %v157_v63  ;;  %v190_v62 = vld [vmem:[#allocation5 + $0x430] sm:$0xff]  ;;  %v256_v63 = vld [vmem:[#allocation5 + $0x640] sm:$0xff] }
  0x62   :  { %597 = vmatprep.subr.mxu0 %v91_v0  ;;  %667 = vmatpush2.msra.mxu1 %v156_v1  ;;  %v189_v0 = vld [vmem:[#allocation5 + $0x428] sm:$0xff]  ;;  %v255_v1 = vld [vmem:[#allocation5 + $0x638] sm:$0xff] }
  0x63   :  { %598 = vmatpush2.msra.mxu0 %v90_v2  ;;  %668 = vmatprep.subr.mxu1 %v155_v3  ;;  %v188_v2 = vld [vmem:[#allocation5 + $0x420] sm:$0xff]  ;;  %v254_v3 = vld [vmem:[#allocation5 + $0x630] sm:$0xff] }
  0x64   :  { %599 = vmatprep.subr.mxu0 %v89_v6  ;;  %601 = vmatprep.mubr.f32.mxu0 %v479_v4  ;;  %v187_v4 = vld [vmem:[#allocation5 + $0x418] sm:$0xff]  ;;  %v186_v6 = vld [vmem:[#allocation5 + $0x410] sm:$0xff] }
  0x65   :  { %600 = vmatpush2.msra.mxu0 %v88_v7  ;;  %669 = vmatpush2.msra.mxu1 %v154_v8  ;;  %v252_v7 = vld [vmem:[#allocation5 + $0x620] sm:$0xff]  ;;  %v185_v8 = vld [vmem:[#allocation5 + $0x408] sm:$0xff] }
  0x66   :  { %602 = vmatmul.mubr.f32.vlgmr.msra.gmra.mxu0 %v471_v58  ;;  %670 = vmatprep.subr.mxu1 %v153_v9  ;;  %v192_v58 = vld [vmem:[#allocation5 + $0x440] sm:$0xff]  ;;  %v251_v9 = vld [vmem:[#allocation5 + $0x618] sm:$0xff] }
  0x67   :  { %679 = vmatprep.subr.mxu0 %v215_v10  ;;  %671 = vmatpush2.msra.mxu1 %v152_v11  ;;  %v184_v10 = vld [vmem:[#allocation5 + $0x400] sm:$0xff]  ;;  %v250_v11 = vld [vmem:[#allocation5 + $0x610] sm:$0xff] }
  0x68   :  { %672 = vmatprep.mubr.f32.mxu1 %v480_v12  ;;  %680 = vmatpush1.msra.mxu0 %v214_v13  ;;  %v247_v12 = vld [vmem:[#allocation5 + $0x5f8] sm:$0xff]  ;;  %v249_v13 = vld [vmem:[#allocation5 + $0x608] sm:$0xff] }
  0x69   :  { %673 = vmatmul.mubr.f32.vlgmr.msra.gmra.mxu1 %v478_v5  ;;  %681 = vmatprep.subr.mxu0 %v213_v14  ;;  %v253_v5 = vld [vmem:[#allocation5 + $0x628] sm:$0xff]  ;;  %v246_v14 = vld [vmem:[#allocation5 + $0x5f0] sm:$0xff] }
  0x6a   :  { %750 = vmatprep.subr.mxu1 %v279_v15  ;;  %682 = vmatpush1.msra.mxu0 %v212_v16  ;;  %v248_v15 = vld [vmem:[#allocation5 + $0x600] sm:$0xff]  ;;  %v245_v16 = vld [vmem:[#allocation5 + $0x5e8] sm:$0xff] }
  0x6b   :  { %751 = vmatpush1.msra.mxu1 %v278_v17  ;;  %683 = vmatprep.subr.mxu0 %v211_v18  ;;  %v311_v17 = vld [vmem:[#allocation5 + $0x7f8] sm:$0xff]  ;;  %v244_v18 = vld [vmem:[#allocation5 + $0x5e0] sm:$0xff] }
  0x6c   :  { %752 = vmatprep.subr.mxu1 %v277_v19  ;;  %684 = vmatpush1.msra.mxu0 %v210_v20  ;;  %v310_v19 = vld [vmem:[#allocation5 + $0x7f0] sm:$0xff]  ;;  %v243_v20 = vld [vmem:[#allocation5 + $0x5d8] sm:$0xff] }
  0x6d   :  { %753 = vmatpush1.msra.mxu1 %v276_v21  ;;  %685 = vmatprep.subr.mxu0 %v209_v22  ;;  %v309_v21 = vld [vmem:[#allocation5 + $0x7e8] sm:$0xff]  ;;  %v242_v22 = vld [vmem:[#allocation5 + $0x5d0] sm:$0xff] }
  0x6e   :  { %754 = vmatprep.subr.mxu1 %v275_v23  ;;  %686 = vmatpush1.msra.mxu0 %v208_v24  ;;  %v308_v23 = vld [vmem:[#allocation5 + $0x7e0] sm:$0xff]  ;;  %v241_v24 = vld [vmem:[#allocation5 + $0x5c8] sm:$0xff] }
  0x6f   :  { %755 = vmatpush1.msra.mxu1 %v274_v25  ;;  %687 = vmatprep.subr.mxu0 %v207_v26  ;;  %v307_v25 = vld [vmem:[#allocation5 + $0x7d8] sm:$0xff]  ;;  %v240_v26 = vld [vmem:[#allocation5 + $0x5c0] sm:$0xff] }
  0x70   :  { %756 = vmatprep.subr.mxu1 %v273_v27  ;;  %688 = vmatpush1.msra.mxu0 %v206_v28  ;;  %v306_v27 = vld [vmem:[#allocation5 + $0x7d0] sm:$0xff]  ;;  %v239_v28 = vld [vmem:[#allocation5 + $0x5b8] sm:$0xff] }
  0x71   :  { %757 = vmatpush1.msra.mxu1 %v272_v29  ;;  %689 = vmatprep.subr.mxu0 %v205_v30  ;;  %v305_v29 = vld [vmem:[#allocation5 + $0x7c8] sm:$0xff]  ;;  %v238_v30 = vld [vmem:[#allocation5 + $0x5b0] sm:$0xff] }
  0x72   :  { %758 = vmatprep.subr.mxu1 %v271_v31  ;;  %690 = vmatpush1.msra.mxu0 %v204_v32  ;;  %v304_v31 = vld [vmem:[#allocation5 + $0x7c0] sm:$0xff]  ;;  %v237_v32 = vld [vmem:[#allocation5 + $0x5a8] sm:$0xff] }
  0x73   :  { %759 = vmatpush1.msra.mxu1 %v270_v33  ;;  %691 = vmatprep.subr.mxu0 %v203_v34  ;;  %v303_v33 = vld [vmem:[#allocation5 + $0x7b8] sm:$0xff]  ;;  %v236_v34 = vld [vmem:[#allocation5 + $0x5a0] sm:$0xff] }
  0x74   :  { %760 = vmatprep.subr.mxu1 %v269_v35  ;;  %692 = vmatpush1.msra.mxu0 %v202_v36  ;;  %v302_v35 = vld [vmem:[#allocation5 + $0x7b0] sm:$0xff]  ;;  %v235_v36 = vld [vmem:[#allocation5 + $0x598] sm:$0xff] }
  0x75   :  { %761 = vmatpush1.msra.mxu1 %v268_v37  ;;  %693 = vmatprep.subr.mxu0 %v201_v39  ;;  %v301_v37 = vld [vmem:[#allocation5 + $0x7a8] sm:$0xff]  ;;  %v234_v39 = vld [vmem:[#allocation5 + $0x590] sm:$0xff] }
  0x76   :  { %762 = vmatprep.subr.mxu1 %v267_v40  ;;  %694 = vmatpush1.msra.mxu0 %v200_v41  ;;  %v300_v40 = vld [vmem:[#allocation5 + $0x7a0] sm:$0xff]  ;;  %v233_v41 = vld [vmem:[#allocation5 + $0x588] sm:$0xff] }
  0x77   :  { %763 = vmatpush1.msra.mxu1 %v266_v42  ;;  %695 = vmatprep.subr.mxu0 %v199_v43  ;;  %v299_v42 = vld [vmem:[#allocation5 + $0x798] sm:$0xff]  ;;  %v232_v43 = vld [vmem:[#allocation5 + $0x580] sm:$0xff] }
  0x78   :  { %764 = vmatprep.subr.mxu1 %v265_v44  ;;  %696 = vmatpush1.msra.mxu0 %v198_v45  ;;  %v298_v44 = vld [vmem:[#allocation5 + $0x790] sm:$0xff]  ;;  %v231_v45 = vld [vmem:[#allocation5 + $0x578] sm:$0xff] }
  0x79   :  { %765 = vmatpush1.msra.mxu1 %v264_v46  ;;  %697 = vmatprep.subr.mxu0 %v197_v47  ;;  %v297_v46 = vld [vmem:[#allocation5 + $0x788] sm:$0xff]  ;;  %v230_v47 = vld [vmem:[#allocation5 + $0x570] sm:$0xff] }
  0x7a   :  { %766 = vmatprep.subr.mxu1 %v263_v49  ;;  %698 = vmatpush1.msra.mxu0 %v196_v50  ;;  %v296_v49 = vld [vmem:[#allocation5 + $0x780] sm:$0xff]  ;;  %v229_v50 = vld [vmem:[#allocation5 + $0x568] sm:$0xff] }
  0x7b   :  { %767 = vmatpush1.msra.mxu1 %v262_v51  ;;  %699 = vmatprep.subr.mxu0 %v195_v52  ;;  %v295_v51 = vld [vmem:[#allocation5 + $0x778] sm:$0xff]  ;;  %v228_v52 = vld [vmem:[#allocation5 + $0x560] sm:$0xff] }
  0x7c   :  { %768 = vmatprep.subr.mxu1 %v261_v53  ;;  %700 = vmatpush1.msra.mxu0 %v194_v54  ;;  %v294_v53 = vld [vmem:[#allocation5 + $0x770] sm:$0xff]  ;;  %v227_v54 = vld [vmem:[#allocation5 + $0x558] sm:$0xff] }
  0x7d   :  { %769 = vmatpush1.msra.mxu1 %v260_v55  ;;  %701 = vmatprep.subr.mxu0 %v193_v56  ;;  %v293_v55 = vld [vmem:[#allocation5 + $0x768] sm:$0xff]  ;;  %v226_v56 = vld [vmem:[#allocation5 + $0x550] sm:$0xff] }
  0x7e   :  { %770 = vmatprep.subr.mxu1 %v259_v57  ;;  %702 = vmatpush1.msra.mxu0 %v192_v58  ;;  %v292_v57 = vld [vmem:[#allocation5 + $0x760] sm:$0xff]  ;;  %v225_v58 = vld [vmem:[#allocation5 + $0x548] sm:$0xff] }
  0x7f   :  { %771 = vmatpush1.msra.mxu1 %v258_v59  ;;  %703 = vmatprep.subr.mxu0 %v191_v60  ;;  %v291_v59 = vld [vmem:[#allocation5 + $0x758] sm:$0xff]  ;;  %v224_v60 = vld [vmem:[#allocation5 + $0x540] sm:$0xff] }
  0x80   :  { %772 = vmatprep.subr.mxu1 %v257_v61  ;;  %704 = vmatpush1.msra.mxu0 %v190_v62  ;;  %v53_v61 = vld [vmem:[#allocation2 + $0x8] sm:$0xff] }
  0x81   :  { %773 = vmatpush1.msra.mxu1 %v256_v63  ;;  %705 = vmatprep.subr.mxu0 %v189_v0  ;;  %v290_v62 = vld [vmem:[#allocation5 + $0x750] sm:$0xff]  ;;  %v223_v63 = vld [vmem:[#allocation5 + $0x538] sm:$0xff]  ;;  %v289_v0 = vld [vmem:[#allocation5 + $0x748] sm:$0xff] }
  0x82   :  { %774 = vmatprep.subr.mxu1 %v255_v1  ;;  %706 = vmatpush1.msra.mxu0 %v188_v2  ;;  %v222_v1 = vld [vmem:[#allocation5 + $0x530] sm:$0xff]  ;;  %v288_v2 = vld [vmem:[#allocation5 + $0x740] sm:$0xff] }
  0x83   :  { %775 = vmatpush1.msra.mxu1 %v254_v3  ;;  %707 = vmatprep.subr.mxu0 %v187_v4  ;;  %v221_v3 = vld [vmem:[#allocation5 + $0x528] sm:$0xff]  ;;  %v481_v4 = vcombine.high %v53_v61, %v53_v61 }
  0x84   :  { %776 = vmatprep.subr.mxu1 %v253_v5  ;;  %708 = vmatpush1.msra.mxu0 %v186_v6  ;;  %v287_v5 = vld [vmem:[#allocation5 + $0x738] sm:$0xff]  ;;  %v220_v6 = vld [vmem:[#allocation5 + $0x520] sm:$0xff] }
  0x85   :  { %777 = vmatpush1.msra.mxu1 %v252_v7  ;;  %709 = vmatprep.subr.mxu0 %v185_v8  ;;  %v488_v7 = vrot.slane %v53_v61, %v1223_v48  ;;  %v286_v8 = vld [vmem:[#allocation5 + $0x730] sm:$0xff] }
  0x86   :  { %778 = vmatprep.subr.mxu1 %v251_v9  ;;  %710 = vmatpush1.msra.mxu0 %v184_v10  ;;  %v219_v9 = vld [vmem:[#allocation5 + $0x518] sm:$0xff]  ;;  %v285_v10 = vld [vmem:[#allocation5 + $0x728] sm:$0xff]  ;;  %v390_v61 = vld [vmem:[#allocation5 + $0xa70] sm:$0xff] }
  0x87   :  { %779 = vmatpush1.msra.mxu1 %v250_v11  ;;  %711 = vmatprep.subr.mxu0 %v247_v12  ;;  %v218_v11 = vld [vmem:[#allocation5 + $0x510] sm:$0xff]  ;;  %v284_v12 = vld [vmem:[#allocation5 + $0x720] sm:$0xff] }
  0x88   :  { %780 = vmatprep.subr.mxu1 %v249_v13  ;;  %712 = vmatpush2.msra.mxu0 %v246_v14  ;;  %v217_v13 = vld [vmem:[#allocation5 + $0x508] sm:$0xff]  ;;  %v495_v14 = vrot.slane %v481_v4, %v1223_v48  ;;  %v320_v4 = vld [vmem:[#allocation5 + $0x840] sm:$0xff] }
  0x89   :  { %781 = vmatpush1.msra.mxu1 %v248_v15  ;;  %713 = vmatprep.subr.mxu0 %v245_v16  ;;  %v283_v15 = vld [vmem:[#allocation5 + $0x718] sm:$0xff]  ;;  %v216_v16 = vld [vmem:[#allocation5 + $0x500] sm:$0xff] }
  0x8a   :  { %782 = vmatprep.subr.mxu1 %v311_v17  ;;  %714 = vmatpush2.msra.mxu0 %v244_v18  ;;  %v496_v17 = vcombine.high %v488_v7, %v488_v7  ;;  %v282_v18 = vld [vmem:[#allocation5 + $0x710] sm:$0xff] }
  0x8b   :  { %783 = vmatpush2.msra.mxu1 %v310_v19  ;;  %715 = vmatprep.subr.mxu0 %v243_v20  ;;  %v281_v19 = vld [vmem:[#allocation5 + $0x708] sm:$0xff]  ;;  %v343_v20 = vld [vmem:[#allocation5 + $0x8f8] sm:$0xff] }
  0x8c   :  { %784 = vmatprep.subr.mxu1 %v309_v21  ;;  %716 = vmatpush2.msra.mxu0 %v242_v22  ;;  %v280_v21 = vld [vmem:[#allocation5 + $0x700] sm:$0xff]  ;;  %v497_v22 = vcombine.high %v495_v14, %v495_v14 }
  0x8d   :  { %785 = vmatpush2.msra.mxu1 %v308_v23  ;;  %717 = vmatprep.subr.mxu0 %v241_v24  ;;  %v342_v23 = vld [vmem:[#allocation5 + $0x8f0] sm:$0xff]  ;;  %v341_v24 = vld [vmem:[#allocation5 + $0x8e8] sm:$0xff] }
  0x8e   :  { %786 = vmatprep.subr.mxu1 %v307_v25  ;;  %718 = vmatpush2.msra.mxu0 %v240_v26  ;;  %v407_v25 = vld [vmem:[#allocation5 + $0xaf8] sm:$0xff]  ;;  %v340_v26 = vld [vmem:[#allocation5 + $0x8e0] sm:$0xff] }
  0x8f   :  { %787 = vmatpush2.msra.mxu1 %v306_v27  ;;  %719 = vmatprep.subr.mxu0 %v239_v28  ;;  %v406_v27 = vld [vmem:[#allocation5 + $0xaf0] sm:$0xff]  ;;  %v339_v28 = vld [vmem:[#allocation5 + $0x8d8] sm:$0xff] }
  0x90   :  { %788 = vmatprep.subr.mxu1 %v305_v29  ;;  %720 = vmatpush2.msra.mxu0 %v238_v30  ;;  %v405_v29 = vld [vmem:[#allocation5 + $0xae8] sm:$0xff]  ;;  %v338_v30 = vld [vmem:[#allocation5 + $0x8d0] sm:$0xff] }
  0x91   :  { %789 = vmatpush2.msra.mxu1 %v304_v31  ;;  %721 = vmatprep.subr.mxu0 %v237_v32  ;;  %v404_v31 = vld [vmem:[#allocation5 + $0xae0] sm:$0xff]  ;;  %v337_v32 = vld [vmem:[#allocation5 + $0x8c8] sm:$0xff] }
  0x92   :  { %790 = vmatprep.subr.mxu1 %v303_v33  ;;  %722 = vmatpush2.msra.mxu0 %v236_v34  ;;  %v403_v33 = vld [vmem:[#allocation5 + $0xad8] sm:$0xff]  ;;  %v336_v34 = vld [vmem:[#allocation5 + $0x8c0] sm:$0xff] }
  0x93   :  { %791 = vmatpush2.msra.mxu1 %v302_v35  ;;  %723 = vmatprep.subr.mxu0 %v235_v36  ;;  %v402_v35 = vld [vmem:[#allocation5 + $0xad0] sm:$0xff]  ;;  %v335_v36 = vld [vmem:[#allocation5 + $0x8b8] sm:$0xff] }
  0x94   :  { %792 = vmatprep.subr.mxu1 %v301_v37  ;;  %724 = vmatpush2.msra.mxu0 %v234_v39  ;;  %v401_v37 = vld [vmem:[#allocation5 + $0xac8] sm:$0xff]  ;;  %v334_v39 = vld [vmem:[#allocation5 + $0x8b0] sm:$0xff] }
  0x95   :  { %793 = vmatpush2.msra.mxu1 %v300_v40  ;;  %725 = vmatprep.subr.mxu0 %v233_v41  ;;  %v400_v40 = vld [vmem:[#allocation5 + $0xac0] sm:$0xff]  ;;  %v333_v41 = vld [vmem:[#allocation5 + $0x8a8] sm:$0xff] }
  0x96   :  { %794 = vmatprep.subr.mxu1 %v299_v42  ;;  %726 = vmatpush2.msra.mxu0 %v232_v43  ;;  %v399_v42 = vld [vmem:[#allocation5 + $0xab8] sm:$0xff]  ;;  %v332_v43 = vld [vmem:[#allocation5 + $0x8a0] sm:$0xff] }
  0x97   :  { %795 = vmatpush2.msra.mxu1 %v298_v44  ;;  %727 = vmatprep.subr.mxu0 %v231_v45  ;;  %v398_v44 = vld [vmem:[#allocation5 + $0xab0] sm:$0xff]  ;;  %v331_v45 = vld [vmem:[#allocation5 + $0x898] sm:$0xff] }
  0x98   :  { %796 = vmatprep.subr.mxu1 %v297_v46  ;;  %728 = vmatpush2.msra.mxu0 %v230_v47  ;;  %v397_v46 = vld [vmem:[#allocation5 + $0xaa8] sm:$0xff]  ;;  %v330_v47 = vld [vmem:[#allocation5 + $0x890] sm:$0xff] }
  0x99   :  { %797 = vmatpush2.msra.mxu1 %v296_v49  ;;  %729 = vmatprep.subr.mxu0 %v229_v50  ;;  %v396_v49 = vld [vmem:[#allocation5 + $0xaa0] sm:$0xff]  ;;  %v329_v50 = vld [vmem:[#allocation5 + $0x888] sm:$0xff] }
  0x9a   :  { %798 = vmatprep.subr.mxu1 %v295_v51  ;;  %730 = vmatpush2.msra.mxu0 %v228_v52  ;;  %v395_v51 = vld [vmem:[#allocation5 + $0xa98] sm:$0xff]  ;;  %v328_v52 = vld [vmem:[#allocation5 + $0x880] sm:$0xff] }
  0x9b   :  { %799 = vmatpush2.msra.mxu1 %v294_v53  ;;  %731 = vmatprep.subr.mxu0 %v227_v54  ;;  %v394_v53 = vld [vmem:[#allocation5 + $0xa90] sm:$0xff]  ;;  %v327_v54 = vld [vmem:[#allocation5 + $0x878] sm:$0xff] }
  0x9c   :  { %800 = vmatprep.subr.mxu1 %v293_v55  ;;  %732 = vmatpush2.msra.mxu0 %v226_v56  ;;  %v393_v55 = vld [vmem:[#allocation5 + $0xa88] sm:$0xff]  ;;  %v326_v56 = vld [vmem:[#allocation5 + $0x870] sm:$0xff] }
  0x9d   :  { %801 = vmatpush2.msra.mxu1 %v292_v57  ;;  %733 = vmatprep.subr.mxu0 %v225_v58  ;;  %v392_v57 = vld [vmem:[#allocation5 + $0xa80] sm:$0xff]  ;;  %v325_v58 = vld [vmem:[#allocation5 + $0x868] sm:$0xff] }
  0x9e   :  { %802 = vmatprep.subr.mxu1 %v291_v59  ;;  %734 = vmatpush2.msra.mxu0 %v224_v60  ;;  %v391_v59 = vld [vmem:[#allocation5 + $0xa78] sm:$0xff]  ;;  %v324_v60 = vld [vmem:[#allocation5 + $0x860] sm:$0xff] }
  0x9f   :  { %803 = vmatpush2.msra.mxu1 %v290_v62  ;;  %735 = vmatprep.subr.mxu0 %v223_v63  ;;  %v323_v62 = vld [vmem:[#allocation5 + $0x858] sm:$0xff]  ;;  %v389_v63 = vld [vmem:[#allocation5 + $0xa68] sm:$0xff] }
  0xa0   :  { %804 = vmatprep.subr.mxu1 %v289_v0  ;;  %736 = vmatpush2.msra.mxu0 %v222_v1  ;;  %v322_v0 = vld [vmem:[#allocation5 + $0x850] sm:$0xff]  ;;  %v388_v1 = vld [vmem:[#allocation5 + $0xa60] sm:$0xff] }
  0xa1   :  { %805 = vmatpush2.msra.mxu1 %v288_v2  ;;  %737 = vmatprep.subr.mxu0 %v221_v3  ;;  %v321_v2 = vld [vmem:[#allocation5 + $0x848] sm:$0xff]  ;;  %v387_v3 = vld [vmem:[#allocation5 + $0xa58] sm:$0xff] }
  0xa2   :  { %806 = vmatprep.subr.mxu1 %v287_v5  ;;  %738 = vmatpush2.msra.mxu0 %v220_v6  ;;  %v386_v5 = vld [vmem:[#allocation5 + $0xa50] sm:$0xff]  ;;  %v319_v6 = vld [vmem:[#allocation5 + $0x838] sm:$0xff] }
  0xa3   :  { %807 = vmatpush2.msra.mxu1 %v286_v8  ;;  %739 = vmatprep.subr.mxu0 %v219_v9  ;;  %v318_v8 = vld [vmem:[#allocation5 + $0x830] sm:$0xff]  ;;  %v384_v9 = vld [vmem:[#allocation5 + $0xa40] sm:$0xff] }
  0xa4   :  { %808 = vmatprep.subr.mxu1 %v285_v10  ;;  %740 = vmatpush2.msra.mxu0 %v218_v11  ;;  %v317_v10 = vld [vmem:[#allocation5 + $0x828] sm:$0xff]  ;;  %v383_v11 = vld [vmem:[#allocation5 + $0xa38] sm:$0xff] }
  0xa5   :  { %809 = vmatpush2.msra.mxu1 %v284_v12  ;;  %741 = vmatprep.subr.mxu0 %v217_v13  ;;  %v316_v12 = vld [vmem:[#allocation5 + $0x820] sm:$0xff]  ;;  %v382_v13 = vld [vmem:[#allocation5 + $0xa30] sm:$0xff] }
  0xa6   :  { %810 = vmatprep.subr.mxu1 %v283_v15  ;;  %742 = vmatpush2.msra.mxu0 %v216_v16  ;;  %v381_v15 = vld [vmem:[#allocation5 + $0xa28] sm:$0xff]  ;;  %v314_v16 = vld [vmem:[#allocation5 + $0x810] sm:$0xff] }
  0xa7   :  { %743 = vmatprep.mubr.f32.mxu0 %v496_v17  ;;  %811 = vmatpush2.msra.mxu1 %v282_v18  ;;  %v380_v17 = vld [vmem:[#allocation5 + $0xa20] sm:$0xff]  ;;  %v313_v18 = vld [vmem:[#allocation5 + $0x808] sm:$0xff] }
  0xa8   :  { %744 = vmatmul.mubr.f32.vlgmr.msra.gmra.mxu0 %v488_v7  ;;  %812 = vmatprep.subr.mxu1 %v281_v19  ;;  %v385_v7 = vld [vmem:[#allocation5 + $0xa48] sm:$0xff]  ;;  %v379_v19 = vld [vmem:[#allocation5 + $0xa18] sm:$0xff] }
  0xa9   :  { %821 = vmatprep.subr.mxu0 %v343_v20  ;;  %813 = vmatpush2.msra.mxu1 %v280_v21  ;;  %v312_v20 = vld [vmem:[#allocation5 + $0x800] sm:$0xff]  ;;  %v378_v21 = vld [vmem:[#allocation5 + $0xa10] sm:$0xff] }
  0xaa   :  { %814 = vmatprep.mubr.f32.mxu1 %v497_v22  ;;  %822 = vmatpush1.msra.mxu0 %v342_v23  ;;  %v375_v22 = vld [vmem:[#allocation5 + $0x9f8] sm:$0xff]  ;;  %v377_v23 = vld [vmem:[#allocation5 + $0xa08] sm:$0xff] }
  0xab   :  { %815 = vmatmul.mubr.f32.vlgmr.msra.gmra.mxu1 %v495_v14  ;;  %823 = vmatprep.subr.mxu0 %v341_v24  ;;  %v315_v14 = vld [vmem:[#allocation5 + $0x818] sm:$0xff]  ;;  %v374_v24 = vld [vmem:[#allocation5 + $0x9f0] sm:$0xff] }
  0xac   :  { %892 = vmatprep.subr.mxu1 %v407_v25  ;;  %824 = vmatpush1.msra.mxu0 %v340_v26  ;;  %v376_v25 = vld [vmem:[#allocation5 + $0xa00] sm:$0xff]  ;;  %v373_v26 = vld [vmem:[#allocation5 + $0x9e8] sm:$0xff] }
  0xad   :  { %893 = vmatpush1.msra.mxu1 %v406_v27  ;;  %825 = vmatprep.subr.mxu0 %v339_v28  ;;  %v439_v27 = vld [vmem:[#allocation5 + $0xbf8] sm:$0xff]  ;;  %v372_v28 = vld [vmem:[#allocation5 + $0x9e0] sm:$0xff] }
  0xae   :  { %894 = vmatprep.subr.mxu1 %v405_v29  ;;  %826 = vmatpush1.msra.mxu0 %v338_v30  ;;  %v438_v29 = vld [vmem:[#allocation5 + $0xbf0] sm:$0xff]  ;;  %v371_v30 = vld [vmem:[#allocation5 + $0x9d8] sm:$0xff] }
  0xaf   :  { %895 = vmatpush1.msra.mxu1 %v404_v31  ;;  %827 = vmatprep.subr.mxu0 %v337_v32  ;;  %v437_v31 = vld [vmem:[#allocation5 + $0xbe8] sm:$0xff]  ;;  %v370_v32 = vld [vmem:[#allocation5 + $0x9d0] sm:$0xff] }
  0xb0   :  { %896 = vmatprep.subr.mxu1 %v403_v33  ;;  %828 = vmatpush1.msra.mxu0 %v336_v34  ;;  %v436_v33 = vld [vmem:[#allocation5 + $0xbe0] sm:$0xff]  ;;  %v369_v34 = vld [vmem:[#allocation5 + $0x9c8] sm:$0xff] }
  0xb1   :  { %897 = vmatpush1.msra.mxu1 %v402_v35  ;;  %829 = vmatprep.subr.mxu0 %v335_v36  ;;  %v435_v35 = vld [vmem:[#allocation5 + $0xbd8] sm:$0xff]  ;;  %v368_v36 = vld [vmem:[#allocation5 + $0x9c0] sm:$0xff] }
  0xb2   :  { %898 = vmatprep.subr.mxu1 %v401_v37  ;;  %830 = vmatpush1.msra.mxu0 %v334_v39  ;;  %v434_v37 = vld [vmem:[#allocation5 + $0xbd0] sm:$0xff]  ;;  %v367_v39 = vld [vmem:[#allocation5 + $0x9b8] sm:$0xff] }
  0xb3   :  { %899 = vmatpush1.msra.mxu1 %v400_v40  ;;  %831 = vmatprep.subr.mxu0 %v333_v41  ;;  %v433_v40 = vld [vmem:[#allocation5 + $0xbc8] sm:$0xff]  ;;  %v366_v41 = vld [vmem:[#allocation5 + $0x9b0] sm:$0xff] }
  0xb4   :  { %900 = vmatprep.subr.mxu1 %v399_v42  ;;  %832 = vmatpush1.msra.mxu0 %v332_v43  ;;  %v432_v42 = vld [vmem:[#allocation5 + $0xbc0] sm:$0xff]  ;;  %v365_v43 = vld [vmem:[#allocation5 + $0x9a8] sm:$0xff] }
  0xb5   :  { %901 = vmatpush1.msra.mxu1 %v398_v44  ;;  %833 = vmatprep.subr.mxu0 %v331_v45  ;;  %v431_v44 = vld [vmem:[#allocation5 + $0xbb8] sm:$0xff]  ;;  %v364_v45 = vld [vmem:[#allocation5 + $0x9a0] sm:$0xff] }
  0xb6   :  { %902 = vmatprep.subr.mxu1 %v397_v46  ;;  %834 = vmatpush1.msra.mxu0 %v330_v47  ;;  %v430_v46 = vld [vmem:[#allocation5 + $0xbb0] sm:$0xff]  ;;  %v363_v47 = vld [vmem:[#allocation5 + $0x998] sm:$0xff] }
  0xb7   :  { %903 = vmatpush1.msra.mxu1 %v396_v49  ;;  %835 = vmatprep.subr.mxu0 %v329_v50  ;;  %v429_v49 = vld [vmem:[#allocation5 + $0xba8] sm:$0xff]  ;;  %v362_v50 = vld [vmem:[#allocation5 + $0x990] sm:$0xff] }
  0xb8   :  { %904 = vmatprep.subr.mxu1 %v395_v51  ;;  %836 = vmatpush1.msra.mxu0 %v328_v52  ;;  %v428_v51 = vld [vmem:[#allocation5 + $0xba0] sm:$0xff]  ;;  %v361_v52 = vld [vmem:[#allocation5 + $0x988] sm:$0xff] }
  0xb9   :  { %905 = vmatpush1.msra.mxu1 %v394_v53  ;;  %837 = vmatprep.subr.mxu0 %v327_v54  ;;  %v427_v53 = vld [vmem:[#allocation5 + $0xb98] sm:$0xff]  ;;  %v360_v54 = vld [vmem:[#allocation5 + $0x980] sm:$0xff] }
  0xba   :  { %906 = vmatprep.subr.mxu1 %v393_v55  ;;  %838 = vmatpush1.msra.mxu0 %v326_v56  ;;  %v426_v55 = vld [vmem:[#allocation5 + $0xb90] sm:$0xff]  ;;  %v359_v56 = vld [vmem:[#allocation5 + $0x978] sm:$0xff] }
  0xbb   :  { %907 = vmatpush1.msra.mxu1 %v392_v57  ;;  %839 = vmatprep.subr.mxu0 %v325_v58  ;;  %v425_v57 = vld [vmem:[#allocation5 + $0xb88] sm:$0xff]  ;;  %v358_v58 = vld [vmem:[#allocation5 + $0x970] sm:$0xff] }
  0xbc   :  { %908 = vmatprep.subr.mxu1 %v391_v59  ;;  %840 = vmatpush1.msra.mxu0 %v324_v60  ;;  %v424_v59 = vld [vmem:[#allocation5 + $0xb80] sm:$0xff]  ;;  %v357_v60 = vld [vmem:[#allocation5 + $0x968] sm:$0xff] }
  0xbd   :  { %909 = vmatpush1.msra.mxu1 %v390_v61  ;;  %841 = vmatprep.subr.mxu0 %v323_v62  ;;  %v423_v61 = vld [vmem:[#allocation5 + $0xb78] sm:$0xff]  ;;  %v356_v62 = vld [vmem:[#allocation5 + $0x960] sm:$0xff] }
  0xbe   :  { %910 = vmatprep.subr.mxu1 %v389_v63  ;;  %842 = vmatpush1.msra.mxu0 %v322_v0  ;;  %v422_v63 = vld [vmem:[#allocation5 + $0xb70] sm:$0xff]  ;;  %v355_v0 = vld [vmem:[#allocation5 + $0x958] sm:$0xff] }
  0xbf   :  { %911 = vmatpush1.msra.mxu1 %v388_v1  ;;  %843 = vmatprep.subr.mxu0 %v321_v2  ;;  %v421_v1 = vld [vmem:[#allocation5 + $0xb68] sm:$0xff]  ;;  %v354_v2 = vld [vmem:[#allocation5 + $0x950] sm:$0xff] }
  0xc0   :  { %912 = vmatprep.subr.mxu1 %v387_v3  ;;  %844 = vmatpush1.msra.mxu0 %v320_v4  ;;  %v420_v3 = vld [vmem:[#allocation5 + $0xb60] sm:$0xff]  ;;  %v353_v4 = vld [vmem:[#allocation5 + $0x948] sm:$0xff] }
  0xc1   :  { %913 = vmatpush1.msra.mxu1 %v386_v5  ;;  %845 = vmatprep.subr.mxu0 %v319_v6  ;;  %v419_v5 = vld [vmem:[#allocation5 + $0xb58] sm:$0xff]  ;;  %v352_v6 = vld [vmem:[#allocation5 + $0x940] sm:$0xff] }
  0xc2   :  { %914 = vmatprep.subr.mxu1 %v385_v7  ;;  %846 = vmatpush1.msra.mxu0 %v318_v8  ;;  %v54_v7 = vld [vmem:[#allocation2 + $0x10] sm:$0xff] }
  0xc3   :  { %915 = vmatpush1.msra.mxu1 %v384_v9  ;;  %847 = vmatprep.subr.mxu0 %v317_v10  ;;  %v418_v8 = vld [vmem:[#allocation5 + $0xb50] sm:$0xff]  ;;  %v351_v9 = vld [vmem:[#allocation5 + $0x938] sm:$0xff]  ;;  %v417_v10 = vld [vmem:[#allocation5 + $0xb48] sm:$0xff] }
  0xc4   :  { %916 = vmatprep.subr.mxu1 %v383_v11  ;;  %848 = vmatpush1.msra.mxu0 %v316_v12  ;;  %v350_v11 = vld [vmem:[#allocation5 + $0x930] sm:$0xff]  ;;  %v416_v12 = vld [vmem:[#allocation5 + $0xb40] sm:$0xff] }
  0xc5   :  { %917 = vmatpush1.msra.mxu1 %v382_v13  ;;  %849 = vmatprep.subr.mxu0 %v315_v14  ;;  %v349_v13 = vld [vmem:[#allocation5 + $0x928] sm:$0xff]  ;;  %v498_v14 = vcombine.high %v54_v7, %v54_v7 }
  0xc6   :  { %918 = vmatprep.subr.mxu1 %v381_v15  ;;  %850 = vmatpush1.msra.mxu0 %v314_v16  ;;  %v415_v15 = vld [vmem:[#allocation5 + $0xb38] sm:$0xff]  ;;  %v348_v16 = vld [vmem:[#allocation5 + $0x920] sm:$0xff] }
  0xc7   :  { %919 = vmatpush1.msra.mxu1 %v380_v17  ;;  %851 = vmatprep.subr.mxu0 %v313_v18  ;;  %v505_v17 = vrot.slane %v54_v7, %v1223_v48  ;;  %v414_v18 = vld [vmem:[#allocation5 + $0xb30] sm:$0xff] }
  0xc8   :  { %920 = vmatprep.subr.mxu1 %v379_v19  ;;  %852 = vmatpush1.msra.mxu0 %v312_v20  ;;  %v347_v19 = vld [vmem:[#allocation5 + $0x918] sm:$0xff]  ;;  %v413_v20 = vld [vmem:[#allocation5 + $0xb28] sm:$0xff] }
  0xc9   :  { %921 = vmatpush1.msra.mxu1 %v378_v21  ;;  %853 = vmatprep.subr.mxu0 %v375_v22  ;;  %v346_v21 = vld [vmem:[#allocation5 + $0x910] sm:$0xff]  ;;  %v412_v22 = vld [vmem:[#allocation5 + $0xb20] sm:$0xff] }
  0xca   :  { %922 = vmatprep.subr.mxu1 %v377_v23  ;;  %854 = vmatpush2.msra.mxu0 %v374_v24  ;;  %v345_v23 = vld [vmem:[#allocation5 + $0x908] sm:$0xff]  ;;  %v512_v24 = vrot.slane %v498_v14, %v1223_v48 }
  0xcb   :  { %923 = vmatpush1.msra.mxu1 %v376_v25  ;;  %855 = vmatprep.subr.mxu0 %v373_v26  ;;  %v411_v25 = vld [vmem:[#allocation5 + $0xb18] sm:$0xff]  ;;  %v344_v26 = vld [vmem:[#allocation5 + $0x900] sm:$0xff] }
  0xcc   :  { %924 = vmatprep.subr.mxu1 %v439_v27  ;;  %856 = vmatpush2.msra.mxu0 %v372_v28  ;;  %v513_v27 = vcombine.high %v505_v17, %v505_v17  ;;  %v410_v28 = vld [vmem:[#allocation5 + $0xb10] sm:$0xff] }
  0xcd   :  { %925 = vmatpush2.msra.mxu1 %v438_v29  ;;  %857 = vmatprep.subr.mxu0 %v371_v30  ;;  %v409_v29 = vld [vmem:[#allocation5 + $0xb08] sm:$0xff]  ;;  %v447_v30 = vld [vmem:[#allocation5 + $0xc38] sm:$0xff] }
  0xce   :  { %926 = vmatprep.subr.mxu1 %v437_v31  ;;  %858 = vmatpush2.msra.mxu0 %v370_v32  ;;  %v408_v31 = vld [vmem:[#allocation5 + $0xb00] sm:$0xff]  ;;  %v514_v32 = vcombine.high %v512_v24, %v512_v24 }
  0xcf   :  { %927 = vmatpush2.msra.mxu1 %v436_v33  ;;  %859 = vmatprep.subr.mxu0 %v369_v34  ;;  %v446_v33 = vld [vmem:[#allocation5 + $0xc30] sm:$0xff]  ;;  %v445_v34 = vld [vmem:[#allocation5 + $0xc28] sm:$0xff] }
  0xd0   :  { %928 = vmatprep.subr.mxu1 %v435_v35  ;;  %860 = vmatpush2.msra.mxu0 %v368_v36  ;;  %v444_v35 = vld [vmem:[#allocation5 + $0xc20] sm:$0xff]  ;;  %v443_v36 = vld [vmem:[#allocation5 + $0xc18] sm:$0xff] }
  0xd1   :  { %929 = vmatpush2.msra.mxu1 %v434_v37  ;;  %861 = vmatprep.subr.mxu0 %v367_v39  ;;  %v442_v37 = vld [vmem:[#allocation5 + $0xc10] sm:$0xff]  ;;  %v441_v39 = vld [vmem:[#allocation5 + $0xc08] sm:$0xff] }
  0xd2   :  { %930 = vmatprep.subr.mxu1 %v433_v40  ;;  %862 = vmatpush2.msra.mxu0 %v366_v41  ;;  %v1189_v40 = vmov 0.0   ;;  %v440_v41 = vld [vmem:[#allocation5 + $0xc00] sm:$0xff] }
  0xd3   :  { %931 = vmatpush2.msra.mxu1 %v432_v42  ;;  %863 = vmatprep.subr.mxu0 %v365_v43  ;;  %v1080_v42 = vld.sshfl [vmem:[#allocation2 + $0x18] sm:$0x3 pattern:$0x76325410]  ;;  %v452_v43 = vsub.s32 0, %v1220_v38 }
  0xd4   :  { %932 = vmatprep.subr.mxu1 %v431_v44  ;;  %864 = vmatpush2.msra.mxu0 %v364_v45  ;;  %v448_v44 = vld [vmem:[#allocation7] sm:$0x3]  ;;  %v456_v45 = vsub.s32 1, %v1220_v38 }
  0xd5   :  { %933 = vmatpush2.msra.mxu1 %v430_v46  ;;  %865 = vmatprep.subr.mxu0 %v363_v47  ;;  %v453_v47 = vrot.slane %v448_v44, %v452_v43 }
  0xd6   :  { %934 = vmatprep.subr.mxu1 %v429_v49  ;;  %866 = vmatpush2.msra.mxu0 %v362_v50  ;;  %v457_v49 = vrot.slane %v448_v44, %v456_v45 }
  0xd7   :  { %935 = vmatpush2.msra.mxu1 %v428_v51  ;;  %867 = vmatprep.subr.mxu0 %v361_v52 }
  0xd8   :  { %936 = vmatprep.subr.mxu1 %v427_v53  ;;  %868 = vmatpush2.msra.mxu0 %v360_v54 }
  0xd9   :  { %937 = vmatpush2.msra.mxu1 %v426_v55  ;;  %869 = vmatprep.subr.mxu0 %v359_v56 }
  0xda   :  { %938 = vmatprep.subr.mxu1 %v425_v57  ;;  %870 = vmatpush2.msra.mxu0 %v358_v58 }
  0xdb   :  { %939 = vmatpush2.msra.mxu1 %v424_v59  ;;  %871 = vmatprep.subr.mxu0 %v357_v60 }
  0xdc   :  { %940 = vmatprep.subr.mxu1 %v423_v61  ;;  %872 = vmatpush2.msra.mxu0 %v356_v62 }
  0xdd   :  { %941 = vmatpush2.msra.mxu1 %v422_v63  ;;  %873 = vmatprep.subr.mxu0 %v355_v0 }
  0xde   :  { %942 = vmatprep.subr.mxu1 %v421_v1  ;;  %874 = vmatpush2.msra.mxu0 %v354_v2 }
  0xdf   :  { %943 = vmatpush2.msra.mxu1 %v420_v3  ;;  %875 = vmatprep.subr.mxu0 %v353_v4 }
  0xe0   :  { %944 = vmatprep.subr.mxu1 %v419_v5  ;;  %876 = vmatpush2.msra.mxu0 %v352_v6 }
  0xe1   :  { %945 = vmatpush2.msra.mxu1 %v418_v8  ;;  %877 = vmatprep.subr.mxu0 %v351_v9 }
  0xe2   :  { %946 = vmatprep.subr.mxu1 %v417_v10  ;;  %878 = vmatpush2.msra.mxu0 %v350_v11 }
  0xe3   :  { %947 = vmatpush2.msra.mxu1 %v416_v12  ;;  %879 = vmatprep.subr.mxu0 %v349_v13 }
  0xe4   :  { %948 = vmatprep.subr.mxu1 %v415_v15  ;;  %880 = vmatpush2.msra.mxu0 %v348_v16 }
  0xe5   :  { %949 = vmatpush2.msra.mxu1 %v414_v18  ;;  %881 = vmatprep.subr.mxu0 %v347_v19 }
  0xe6   :  { %950 = vmatprep.subr.mxu1 %v413_v20  ;;  %882 = vmatpush2.msra.mxu0 %v346_v21 }
  0xe7   :  { %951 = vmatpush2.msra.mxu1 %v412_v22  ;;  %883 = vmatprep.subr.mxu0 %v345_v23 }
  0xe8   :  { %952 = vmatprep.subr.mxu1 %v411_v25  ;;  %884 = vmatpush2.msra.mxu0 %v344_v26 }
  0xe9   :  { %885 = vmatprep.mubr.f32.mxu0 %v513_v27  ;;  %953 = vmatpush2.msra.mxu1 %v410_v28 }
  0xea   :  { %886 = vmatmul.mubr.f32.vlgmr.msra.gmra.mxu0 %v505_v17  ;;  %954 = vmatprep.subr.mxu1 %v409_v29 }
  0xeb   :  { %987 = vmatprep.subr.mxu0 %v447_v30  ;;  %955 = vmatpush2.msra.mxu1 %v408_v31 }
  0xec   :  { %956 = vmatprep.mubr.f32.mxu1 %v514_v32  ;;  %988 = vmatpush1.msra.mxu0 %v446_v33 }
  0xed   :  { %957 = vmatmul.mubr.f32.vlgmr.msra.gmra.mxu1 %v512_v24  ;;  %989 = vmatprep.subr.mxu0 %v445_v34 }
  0xee   :  { %990 = vmatpush1.msra.mxu0 %v444_v35  ;;  %1027 = vmatprep.mubr.f32.mxu0 %v1189_v40 }
  0xef   :  { %991 = vmatprep.subr.mxu0 %v443_v36 }
  0xf0   :  { %992 = vmatpush1.msra.mxu0 %v442_v37 }
  0xf1   :  { %993 = vmatprep.subr.mxu0 %v441_v39 }
  0xf2   :  { %994 = vmatpush1.msra.mxu0 %v440_v41 }
  0xf3   :  { %1081 = vmatmul.mubr.msk.f32.vlgmr.msra.gmra.mxu0 %vm534_vm0, %v1080_v42 }
 0x126   :  { %v603_v46 = vpop.f32.mrf.mxu0 }
 0x127   :  { %v604_v52 = vadd.f32 %v603_v46, %v453_v47 }
 0x128   :  { %v605_v50 = vpop.f32.mrf.mxu0 }
 0x129   :  { %v674_v51 = vpop.f32.mrf.mxu1  ;;  %v606_v54 = vadd.f32 %v605_v50, %v457_v49 }
 0x12a   :  { %v675_v56 = vadd.f32 %v674_v51, %v604_v52 }
 0x12b   :  { %v676_v55 = vpop.f32.mrf.mxu1 }
 0x12c   :  { %v677_v59 = vadd.f32 %v676_v55, %v606_v54 }
 0x168   :  { %v745_v53 = vpop.f32.mrf.mxu0 }
 0x169   :  { %v746_v60 = vadd.f32 %v745_v53, %v675_v56 }
 0x16a   :  { %v747_v57 = vpop.f32.mrf.mxu0 }
 0x16b   :  { %v816_v58 = vpop.f32.mrf.mxu1  ;;  %v748_v61 = vadd.f32 %v747_v57, %v677_v59 }
 0x16c   :  { %v817_v0 = vadd.f32 %v816_v58, %v746_v60 }
 0x16d   :  { %v818_v63 = vpop.f32.mrf.mxu1 }
 0x16e   :  { %v819_v2 = vadd.f32 %v818_v63, %v748_v61 }
 0x1aa   :  { %v887_v62 = vpop.f32.mrf.mxu0 }
 0x1ab   :  { %v888_v3 = vadd.f32 %v887_v62, %v817_v0 }
 0x1ac   :  { %v889_v1 = vpop.f32.mrf.mxu0 }
 0x1ad   :  { %v958_v38 = vpop.f32.mrf.mxu1  ;;  %v890_v4 = vadd.f32 %v889_v1, %v819_v2 }
 0x1ae   :  { %v959_v6 = vadd.f32 %v958_v38, %v888_v3 }
 0x1af   :  { %v960_v5 = vpop.f32.mrf.mxu1 }
 0x1b0   :  { %v961_v8 = vadd.f32 %v960_v5, %v890_v4 }
 0x1b3   :  { %v1029_v7 = vpop.f32.mrf.mxu0 }
 0x1b4   :  { %v1030_v9 = vadd.f32 %v1029_v7, %v959_v6 }
 0x1b5   :  { %v1031_v10 = vpop.f32.mrf.mxu0 }
 0x1b6   :  { %v1082_v11 = vadd.f32 -1e-10, %v1030_v9  ;;  %v1032_v12 = vadd.f32 %v1031_v10, %v961_v8 }
 0x1b8   :  { %v1036_v13 = vmax.f32 %v1082_v11, 0.0  ;;  %v1083_v14 = vadd.f32 -1e-10, %v1032_v12 }
 0x1ba   :  { %v1038_v15 = vadd.f32 1e-10, %v1036_v13  ;;  %v1037_v16 = vmax.f32 %v1083_v14, 0.0 }
 0x1bc   :  { %v1039_v17 = vadd.f32 1e-10, %v1037_v16  ;;  %v1041_v18 = vsel %vm1040_vm1, %v1038_v15, 0.0 }
 0x1be   :  { %v1043_v19 = vsel %vm1042_vm2, %v1039_v17, 0.0 }
 0x1bf   :  { %v1044_v20 = vadd.f32 %v1043_v19, %v1041_v18 }
 0x1c1   :  { %1045 = vadd.xlane.f32.xlu0 %v1044_v20 }
 0x24a   :  { %v1046_v21 = vpop.xlane.xlu0 %1045 }
 0x24b   :  { %1095 = vrcp.f32 %v1046_v21 }
 0x258   :  { %v1096_v22 = vpop.eup %1095 }
 0x259   :  { %v1048_v23 = vmul.f32 %v1096_v22, %v1038_v15  ;;  %v1049_v24 = vmul.f32 %v1096_v22, %v1039_v17 }
 0x25b   :  { %v1052_v25 = vcombine.low %v1048_v23, %v1049_v24 }
 0x25d   :  { %v1059_v26 = vrot.slane %v1052_v25, %v1223_v48 }
 0x25f   :  { %1063 = vst.msk [vmem:[#allocation8] sm:$0xf] %vm1062_vm4, %v1059_v26 }
 0x260   :  { %1168 = shalt.err (!%p1165_p5)
}
 0x261   :  { %1073 = dma.vmem_to_hbm [thread:$0]  %s1071_s2, 64, %s1242_s3, [#allocation4]  }
 0x262   :  { %1181 = dma.done.wait [#allocation4], 64  }
 0x263   :  { %1182 = vsyncadd [#allocation4], 4294967232 }
 0x264   :  { %1077 = vsyncpa [#allocation3], 1 }
 0x265   :  { %1078 = vsyncpa [#allocation6], 1 }
 0x266   :  { %1079 = vsyncpa [#allocation4], 1 }

</bundles_post_ra>
